<compile_context>
chip_gen: v7x
topology: tpu7x:2x2x1
jax: 0.10.0
libtpu: 0.0.40
codegen_flags: <defaults>
</compile_context>

<pallas_src>
import functools

import jax
import jax.numpy as jnp
from jax.experimental import pallas as pl
from jax.experimental.pallas import tpu as pltpu


# ----------------------------- kernel --------------------------------------- #

def _attn_dot_kernel(q_ref, enc_ref, o_ref):
    """q_ref: (bt, H); enc_ref: (bt, L, H) -> o_ref: (bt, L) softmax over L."""
    q = q_ref[...]                                        # (bt, H)
    enc = enc_ref[...]                                    # (bt, L, H)
    # energies[b, l] = sum_h q[b, h] * enc[b, l, h]
    # VPU multiply + lane reduce: no enc transpose, no M=1 MXU matmul.
    energies = jnp.sum(enc * q[:, None, :], axis=-1)      # (bt, L) float32
    m = jnp.max(energies, axis=-1, keepdims=True)
    e = jnp.exp(energies - m)
    denom = jnp.sum(e, axis=-1, keepdims=True)
    o_ref[...] = (e / denom).astype(o_ref.dtype)          # exact division


# ----------------------------- tiling --------------------------------------- #

def _batch_tile(B, L, H, itemsize, vmem_budget_bytes=40 * 1024 * 1024):
    """Batch tile honoring block-layout rules for the 2D q/out blocks
    (bt must equal B or be a multiple of 8). Budget counts the default
    double-buffering of every BlockSpec (enc + q + out)."""
    per_row = 2 * (L * H * itemsize + H * itemsize + L * 4)
    fit = int(vmem_budget_bytes // max(per_row, 1))
    if B <= 16:
        return B                                   # tiny batch: single dense block
    # prefer >= 2 grid steps so ("parallel",) can shard across v7x's 2 TensorCores
    target = max(min(fit, pl.cdiv(B, 2)), 1)
    bt = (target // 8) * 8
    if bt == 0:
        # TODO(synk): for very large L*H, add an L-tiling grid axis with an online
        # softmax instead of shrinking the batch tile below a dense 8-row block.
        bt = 8
    return min(bt, B)


# ----------------------------- wrapper --------------------------------------- #

@functools.partial(jax.jit, static_argnames=("method",))
def attn_forward(method, hidden, encoder_outputs, params):
    """hidden: (1, B, H); encoder_outputs: (B, L, H) -> (B, 1, L)."""
    B, L, H = encoder_outputs.shape
    h = hidden[0]                                          # (B, H)

    # Hoist the grid-invariant projections out of the kernel (frees VMEM for
    # bigger encoder tiles; all terms dropped are constant over L and cancel
    # under softmax because the reference applies no tanh).
    if method == 'dot':
        q = h
    elif method == 'general':
        q = h @ params['attn_w']                           # (B, H)
    elif method == 'concat':
        u = params['v'] @ params['attn_w'][:, H:]          # (1, H) = v @ W_e
        q = jnp.broadcast_to(u, (B, H))
    else:
        raise ValueError(f"unknown method: {method}")
    q = q.astype(jnp.float32)

    bt = _batch_tile(B, L, H, encoder_outputs.dtype.itemsize)
    grid = (pl.cdiv(B, bt),)

    out = pl.pallas_call(
        _attn_dot_kernel,
        out_shape=jax.ShapeDtypeStruct((B, L), jnp.float32),
        grid=grid,
        in_specs=[pl.BlockSpec((bt, H), lambda i: (i, 0)),
                  pl.BlockSpec((bt, L, H), lambda i: (i, 0, 0))],
        out_specs=pl.BlockSpec((bt, L), lambda i: (i, 0)),
        compiler_params=pltpu.CompilerParams(
            dimension_semantics=("parallel",),
            vmem_limit_bytes=48 * 1024 * 1024),
    )(q, encoder_outputs)

    return out[:, None, :]                                 # == .unsqueeze(1)


# ------------------------- params & pure-JAX reference ----------------------- #

def init_params(key, method, hidden_size):
    """Deterministic parameter init mimicking the shapes in Attn.__init__."""
    H = hidden_size
    params = {}
    if method == 'general':
        k1, k2 = jax.random.split(key, 2)
        bound = 1.0 / jnp.sqrt(H)
        params['attn_w'] = jax.random.uniform(k1, (H, H), jnp.float32, -bound, bound)
        params['attn_b'] = jax.random.uniform(k2, (1, H), jnp.float32, -bound, bound)
    elif method == 'concat':
        k1, k2, k3 = jax.random.split(key, 3)
        bound = 1.0 / jnp.sqrt(2 * H)
        params['attn_w'] = jax.random.uniform(k1, (H, 2 * H), jnp.float32, -bound, bound)
        params['attn_b'] = jax.random.uniform(k2, (1, H), jnp.float32, -bound, bound)
        params['v'] = jax.random.normal(k3, (1, H), jnp.float32)
    return params


def attn_reference(method, hidden, enc, params):
    """Dense JAX transcription of the PyTorch module (bias included, no tanh)."""
    h = hidden[0]                                                     # (B, H)
    if method == 'dot':
        e = jnp.einsum('bh,blh->bl', h, enc)
    elif method == 'general':
        proj = jnp.einsum('blh,gh->blg', enc, params['attn_w']) + params['attn_b'][0]
        e = jnp.einsum('bh,blh->bl', h, proj)
    elif method == 'concat':
        B, L, H = enc.shape
        cat = jnp.concatenate([jnp.broadcast_to(h[:, None, :], (B, L, H)), enc], axis=-1)
        proj = jnp.einsum('blk,gk->blg', cat, params['attn_w']) + params['attn_b'][0]
        e = jnp.einsum('h,blh->bl', params['v'][0], proj)
    else:
        raise ValueError(method)
    return jax.nn.softmax(e, axis=-1)[:, None, :]


# ------------------------------ main ---------------------------------------- #

if __name__ == "__main__":
    B, L, H = 2, 8, 32
    key = jax.random.PRNGKey(0)
    k_hid, k_enc, k_par = jax.random.split(key, 3)

    hidden = jax.random.normal(k_hid, (1, B, H), jnp.float32)           # (1, batch, hidden)
    encoder_outputs = jax.random.normal(k_enc, (B, L, H), jnp.float32)  # (batch, max_len, hidden)

    for method in ('dot', 'general', 'concat'):
        params = init_params(k_par, method, H)
        out = jax.block_until_ready(attn_forward(method, hidden, encoder_outputs, params))
        assert out.shape == (B, 1, L), out.shape
        ref = attn_reference(method, hidden, encoder_outputs, params)
        err = float(jnp.max(jnp.abs(out - ref)))
        assert err < 1e-4, (method, err)
        assert jnp.allclose(jnp.sum(out, axis=-1), 1.0, atol=1e-5)

    print("KERNEL_OK")
</pallas_src>

<mosaic_0001>
module attributes {stable_mosaic.version = 11 : i64} {
  func.func @_attn_dot_kernel(%arg0: i32, %arg1: memref<2x32xf32, #tpu.memory_space<vmem>>, %arg2: memref<2x8x32xf32, #tpu.memory_space<vmem>>, %arg3: memref<2x8xf32, #tpu.memory_space<vmem>>) attributes {dimension_semantics = [#tpu.dimension_semantics<parallel>], iteration_bounds = array<i64: 1>, scalar_prefetch = 0 : i64, scratch_operands = 0 : i64, tpu.core_type = #tpu.core_type<tc>, window_params = [{transform_indices = @transform_0, window_bounds = array<i64: 2, 32>}, {transform_indices = @transform_1, window_bounds = array<i64: 2, 8, 32>}, {transform_indices = @transform_2, window_bounds = array<i64: 2, 8>}]} {
    %c0 = arith.constant 0 : index
    %c0_0 = arith.constant 0 : index
    %0 = vector.load %arg1[%c0, %c0_0] : memref<2x32xf32, #tpu.memory_space<vmem>>, vector<2x32xf32>
    %c0_1 = arith.constant 0 : index
    %c0_2 = arith.constant 0 : index
    %c0_3 = arith.constant 0 : index
    %1 = vector.load %arg2[%c0_1, %c0_2, %c0_3] : memref<2x8x32xf32, #tpu.memory_space<vmem>>, vector<2x8x32xf32>
    %2 = vector.shape_cast %0 : vector<2x32xf32> to vector<2x1x32xf32>
    %3 = vector.broadcast %2 : vector<2x1x32xf32> to vector<2x8x32xf32>
    %4 = arith.mulf %1, %3 : vector<2x8x32xf32>
    %cst = arith.constant dense<0.000000e+00> : vector<2x8xf32>
    %5 = vector.multi_reduction <add>, %4, %cst [2] : vector<2x8x32xf32> to vector<2x8xf32>
    %cst_4 = arith.constant dense<0xFF800000> : vector<2xf32>
    %6 = vector.multi_reduction <maximumf>, %5, %cst_4 [1] : vector<2x8xf32> to vector<2xf32>
    %7 = vector.shape_cast %6 : vector<2xf32> to vector<2x1xf32>
    %8 = vector.broadcast %7 : vector<2x1xf32> to vector<2x8xf32>
    %9 = arith.subf %5, %8 : vector<2x8xf32>
    %10 = math.exp %9 : vector<2x8xf32>
    %cst_5 = arith.constant dense<0.000000e+00> : vector<2xf32>
    %11 = vector.multi_reduction <add>, %10, %cst_5 [1] : vector<2x8xf32> to vector<2xf32>
    %12 = vector.shape_cast %11 : vector<2xf32> to vector<2x1xf32>
    %13 = vector.broadcast %12 : vector<2x1xf32> to vector<2x8xf32>
    %14 = arith.divf %10, %13 : vector<2x8xf32>
    %c0_6 = arith.constant 0 : index
    %c0_7 = arith.constant 0 : index
    %15 = vector.load %arg3[%c0_6, %c0_7] : memref<2x8xf32, #tpu.memory_space<vmem>>, vector<2x8xf32>
    tpu.vector_store %arg3[%c0_6, %c0_7], %14 {strides = array<i32>} : memref<2x8xf32, #tpu.memory_space<vmem>>, vector<2x8xf32>,
    return
  }
  func.func @transform_0(%arg0: i32) -> (i32, i32) {
    %c0_i32 = arith.constant 0 : i32
    %c0_i32_0 = arith.constant 0 : i32
    return %arg0, %c0_i32 : i32, i32
  }
  func.func @transform_1(%arg0: i32) -> (i32, i32, i32) {
    %c0_i32 = arith.constant 0 : i32
    %c0_i32_0 = arith.constant 0 : i32
    %c0_i32_1 = arith.constant 0 : i32
    return %arg0, %c0_i32, %c0_i32_0 : i32, i32, i32
  }
  func.func @transform_2(%arg0: i32) -> (i32, i32) {
    %c0_i32 = arith.constant 0 : i32
    %c0_i32_0 = arith.constant 0 : i32
    return %arg0, %c0_i32 : i32, i32
  }
}

</mosaic_0001>

<bundles_post_ra>
// kernel: attn_forward.1
= control target key start
LH: loop header
LB: loop body
LE: loop exit
PB: predicated region body
PF: predicated region fallthrough
CT: control target
= control target key end

     0   :  { %7 = vsyncpa [#allocation3], 0  ;;  %s304_s0 = inlined_call_operand.vmem [shape: f32[2,32], index: 0, kind: input, shape index: {}]   ;;  %s305_s1 = inlined_call_operand.hbm [shape: f32[2,8,32], index: 1, kind: input, shape index: {}]   ;;  %s306_s2 = inlined_call_operand.hbm [shape: f32[2,8], index: 2, kind: output, shape index: {}]  }
   0x1   :  { %8 = vsyncpa [#allocation4], 0  ;;  %s242_s9 = smov [#allocation2]   ;;  %s194_s13 = scalar_lea.hbm %s305_s1, 256 }
   0x2   :  { %s16_s10 = sshll.u32 %s242_s9, 4  ;;  %p195_p0 = scmp.ne.s32.totalorder %s305_s1, %s194_s13  ;;  %s17_s10 = int_to_ptr.vmem [resolvable:$true] %s16_s10 }
   0x3   :  { %p198_p1 = scmp.lt.u32.totalorder %s194_s13, %s305_s1 }
   0x5   :  { %p200_p2 = pnand %p198_p1, %p195_p0 }
   0x7   :  { %203 = shalt.err (!%p200_p2)
}
   0x8   :  { %s204_s18 = scalar_lea.vmem %s17_s10, 256  ;;  %p209_p4 = scmp.lt.s32.totalorder %s17_s10, %s17_s10 }
   0x9   :  { %p205_p3 = scmp.ne.s32.totalorder %s17_s10, %s204_s18  ;;  %p210_p5 = scmp.lt.s32.totalorder %s204_s18, %s204_s18 }
   0xb   :  { %p211_p6 = por %p210_p5, %p209_p4 }
   0xd   :  { %p212_p7 = pnand %p211_p6, %p205_p3 }
   0xf   :  { %215 = shalt.err (!%p212_p7)
}
  0x10   :  { %s243_s19 = smov 128   ;;  %s244_s20 = smov 8  }
  0x11   :  { %22 = dma.hbm_to_vmem [thread:$0]  %s305_s1, 256, %s17_s10, [#allocation3], %s243_s19, %s243_s19, %s244_s20  }
  0x12   :  { %238 = dma.done.wait [#allocation3], 256  }
  0x13   :  { %239 = vsyncadd [#allocation3], 4294967040  ;;  %v41_v0 = vlaneseq  ;;  %v245_v1 = vmov 1966171168   ;;  %v27_v12 = vld [vmem:[#allocation2] sm:$0xff]  ;;  %vm64_vm0 = vcmask 261120  }
  0x14   :  { %v39_v2 = vunpack.c.l.s4 %v245_v1  ;;  %v177_v9 = vld.sshfl [vmem:[%s304_s0] sm:$0x11 pattern:$0x75316420]  ;;  %v28_v15 = vld [vmem:[#allocation2 + $0x8] sm:$0xff]  ;;  %vm83_vm1 = vcmask 1041409  }
  0x15   :  { %v42_v3 = vshrl.u32 %v41_v0, 7  ;;  %v74_v4 = vand.u32 127, %v41_v0  ;;  %v37_v11 = vcombine.high %v177_v9, %v177_v9  ;;  %vm86_vm2 = vcmask 58368   ;;  %s247_s0 = smov [#allocation5]  }
  0x16   :  { %v40_v5 = vunpack.c.0.s8 %v39_v2  ;;  %v246_v27 = vmov 0   ;;  %s168_s1 = sshll.u32 %s247_s0, 4  ;;  %s169_s1 = int_to_ptr.vmem [resolvable:$true] %s168_s1 }
  0x17   :  { %v275_v6 = vsub.s32 %v74_v4, %v42_v3  ;;  %v54_v8 = vsub.s32 0, %v42_v3  ;;  %185 = vset.pattern.permute.xlu0 %v246_v27  ;;  %184 = vset.pattern.permute.xlu1 %v246_v27  ;;  %v97_v28 = vsub.s32 1, %v42_v3  ;;  %s216_s25 = scalar_lea.vmem %s169_s1, 32  ;;  %p221_p9 = scmp.lt.s32.totalorder %s169_s1, %s169_s1 }
  0x18   :  { %v43_v7 = vsub.s32 %v40_v5, %v42_v3  ;;  %p217_p8 = scmp.ne.s32.totalorder %s169_s1, %s216_s25  ;;  %p222_p10 = scmp.lt.s32.totalorder %s216_s25, %s216_s25 }
  0x1a   :  { %v44_v10 = vrot.slane %v177_v9, %v43_v7  ;;  %v51_v14 = vrot.slane %v37_v11, %v43_v7  ;;  %p223_p11 = por %p222_p10, %p221_p9 }
  0x1c   :  { %v55_v13 = vrot.slane %v44_v10, %v54_v8  ;;  %v59_v17 = vrot.slane %v51_v14, %v54_v8  ;;  %p224_p12 = pnand %p223_p11, %p217_p8 }
  0x1e   :  { %v62_v16 = vmul.f32 %v55_v13, %v27_v12  ;;  %v63_v19 = vmul.f32 %v59_v17, %v28_v15 }
  0x20   :  { %v65_v18 = vsel %vm64_vm0, %v62_v16, 0.0  ;;  %v68_v20 = vsel %vm64_vm0, %v63_v19, 0.0 }
  0x21   :  { %66 = vadd.xlane.f32.xlu0 %v65_v18 }
  0x25   :  { %69 = vadd.xlane.f32.xlu0 %v68_v20 }
  0xae   :  { %v67_v21 = vpop.xlane.xlu0 %66 }
  0xaf   :  { %v78_v23 = vrot.slane %v67_v21, %v275_v6 }
  0xb2   :  { %v70_v22 = vpop.xlane.xlu0 %69 }
  0xb3   :  { %v82_v24 = vrot.slane %v70_v22, %v275_v6 }
  0xb5   :  { %v84_v25 = vsel %vm83_vm1, %v82_v24, %v78_v23 }
  0xb6   :  { %v87_v26 = vsel %vm86_vm2, %v84_v25, -inf }
  0xb7   :  { %88 = vmax.xlane.f32.xlu1 %v87_v26 }
 0x144   :  { %v89_v29 = vpop.xlane.xlu1 %88 }
 0x145   :  { %v94_v30 = vrot.slane %v89_v29, %v54_v8  ;;  %v98_v31 = vrot.slane %v89_v29, %v97_v28 }
 0x147   :  { %v101_v32 = vsub.f32 %v67_v21, %v94_v30  ;;  %v102_v33 = vsub.f32 %v70_v22, %v98_v31 }
 0x149   :  { %v103_v34 = vmul.f32 1.442695, %v101_v32  ;;  %v105_v35 = vmul.f32 1.442695, %v102_v33 }
 0x14b   :  { %186 = vpow2.f32 %v103_v34 }
 0x14c   :  { %188 = vpow2.f32 %v105_v35 }
 0x155   :  { %v187_v36 = vpop.eup %186 }
 0x156   :  { %v189_v37 = vpop.eup %188  ;;  %110 = vperm.xlu1 %184, %v187_v36  }
 0x157   :  { %113 = vperm.xlu0 %185, %v189_v37  }
 0x1d5   :  { %v111_v38 = vpop.permute.xlu1 %110 }
 0x1d6   :  { %v114_v39 = vpop.permute.xlu0 %113  ;;  %v118_v40 = vrot.slane %v111_v38, %v275_v6 }
 0x1d7   :  { %v122_v41 = vrot.slane %v114_v39, %v275_v6 }
 0x1d9   :  { %v123_v42 = vsel %vm83_vm1, %v122_v41, %v118_v40 }
 0x1da   :  { %v125_v43 = vsel %vm86_vm2, %v123_v42, 0.0 }
 0x1db   :  { %126 = vadd.xlane.f32.xlu1 %v125_v43 }
 0x268   :  { %v127_v44 = vpop.xlane.xlu1 %126 }
 0x269   :  { %v132_v45 = vrot.slane %v127_v44, %v54_v8  ;;  %v136_v46 = vrot.slane %v127_v44, %v97_v28 }
 0x26b   :  { %190 = vrcp.f32 %v132_v45 }
 0x26c   :  { %192 = vrcp.f32 %v136_v46 }
 0x275   :  { %v191_v47 = vpop.eup %190 }
 0x276   :  { %v140_v48 = vmul.f32 %v191_v47, %v187_v36  ;;  %v193_v49 = vpop.eup %192 }
 0x277   :  { %v142_v50 = vmul.f32 %v193_v49, %v189_v37 }
 0x278   :  { %146 = vperm.xlu0 %185, %v140_v48  }
 0x27c   :  { %149 = vperm.xlu0 %185, %v142_v50  }
 0x2f7   :  { %v147_v51 = vpop.permute.xlu0 %146 }
 0x2f8   :  { %v154_v53 = vrot.slane %v147_v51, %v275_v6 }
 0x2fb   :  { %v150_v52 = vpop.permute.xlu0 %149 }
 0x2fc   :  { %v158_v54 = vrot.slane %v150_v52, %v275_v6 }
 0x2fe   :  { %v159_v55 = vsel %vm83_vm1, %v158_v54, %v154_v53 }
 0x2ff   :  { %161 = vst.msk [vmem:[#allocation5] sm:$0x3] %vm86_vm2, %v159_v55 }
 0x300   :  { %227 = shalt.err (!%p224_p12)
}
 0x301   :  { %s228_s28 = scalar_lea.hbm %s306_s2, 32 }
 0x302   :  { %p229_p13 = scmp.ne.s32.totalorder %s306_s2, %s228_s28  ;;  %p232_p0 = scmp.lt.u32.totalorder %s228_s28, %s306_s2 }
 0x304   :  { %p234_p1 = pnand %p232_p0, %p229_p13 }
 0x306   :  { %237 = shalt.err (!%p234_p1)
}
 0x307   :  { %171 = dma.vmem_to_hbm [thread:$0]  %s169_s1, 32, %s306_s2, [#allocation4]  }
 0x308   :  { %240 = dma.done.wait [#allocation4], 32  }
 0x309   :  { %241 = vsyncadd [#allocation4], 4294967264 }
 0x30a   :  { %175 = vsyncpa [#allocation3], 1 }
 0x30b   :  { %176 = vsyncpa [#allocation4], 1 }

</bundles_post_ra>
